<compile_context>
chip_gen: v7x
topology: tpu7x:2x2x1
jax: 0.10.0
libtpu: 0.0.40
codegen_flags: <defaults>
</compile_context>

<pallas_src>
import functools

import jax
import jax.numpy as jnp
from jax.experimental import pallas as pl
from jax.experimental.pallas import tpu as pltpu

K_IN = 784      # flattened 28x28 MNIST input
LANE = 128
N_OUT = 10


def _round_up(n, m):
    return (n + m - 1) // m * m


def _mlp_kernel(x_ref, w1_ref, b1_ref, w2_ref, b2_ref, w3_ref, b3_ref, o_ref):
    cdt = w1_ref.dtype  # compute dtype (bf16 fast path or f32 exact path)

    # Layer 1: cast the f32 input tile to the compute dtype on the VPU (cheap,
    # VPU has huge slack here), MXU matmul with f32 accumulation, then bias +
    # ReLU kept in f32 (v5e has no bf16 VPU path).
    h = jnp.dot(x_ref[...].astype(cdt), w1_ref[...],
                preferred_element_type=jnp.float32)
    h = jnp.maximum(h + b1_ref[...], 0.0)
    # custom_layer_1 = nn.Dropout -> identity in eval mode.

    # Layer 2: (bt, Hp) @ (Hp, Hp)
    h = jnp.dot(h.astype(cdt), w2_ref[...], preferred_element_type=jnp.float32)
    h = jnp.maximum(h + b2_ref[...], 0.0)
    # custom_layer_2 = nn.Dropout -> identity in eval mode.

    # Layer 3: (bt, Hp) @ (Hp, 128) -> lane-dense output slab (cols 10: are 0).
    out = jnp.dot(h.astype(cdt), w3_ref[...], preferred_element_type=jnp.float32)
    o_ref[...] = (out + b3_ref[...]).astype(o_ref.dtype)


def prepare_params(params, compute_dtype=jnp.bfloat16):
    """Pad + cast weights/biases ONCE to lane-dense shapes (done outside the
    per-call forward so it never sits on the inference critical path)."""
    w1, b1, w2, b2, w3, b3 = params
    H = w1.shape[1]
    Hp = _round_up(max(H, LANE), LANE)
    Np = _round_up(max(N_OUT, LANE), LANE)
    cdt = compute_dtype
    w1p = jnp.zeros((K_IN, Hp), cdt).at[:, :H].set(w1.astype(cdt))
    w2p = jnp.zeros((Hp, Hp), cdt).at[:H, :H].set(w2.astype(cdt))
    w3p = jnp.zeros((Hp, Np), cdt).at[:H, :N_OUT].set(w3.astype(cdt))
    b1p = jnp.zeros((1, Hp), jnp.float32).at[:, :H].set(
        b1.reshape(1, -1).astype(jnp.float32))
    b2p = jnp.zeros((1, Hp), jnp.float32).at[:, :H].set(
        b2.reshape(1, -1).astype(jnp.float32))
    b3p = jnp.zeros((1, Np), jnp.float32).at[:, :N_OUT].set(
        b3.reshape(1, -1).astype(jnp.float32))
    return (w1p, b1p, w2p, b2p, w3p, b3p)


@functools.partial(jax.jit, static_argnames=("batch_tile",))
def mlp_forward_padded(x, prepared_params, *, batch_tile=1024):
    """Returns the lane-dense (B, 128) logit slab (only cols [:10] valid)."""
    w1p, b1p, w2p, b2p, w3p, b3p = prepared_params
    Np = w3p.shape[1]

    x2d = x.reshape(-1, K_IN)   # view only; no copy, no pre-cast
    B = x2d.shape[0]

    if B <= batch_tile:
        # Single tile: block dim == full array dim satisfies the (8,128) rule
        # even when B is not a multiple of 8.
        bt = B
    else:
        # Keep >= 4 grid steps (v7x: 2 TCs + double-buffering), bt multiple
        # of 8, bt <= batch_tile.  With f32 x fed directly the double-buffered
        # x tile is 2*bt*784*4 B; raise vmem_limit_bytes before pushing
        # batch_tile past ~2048 on v7x's default scoped VMEM.
        bt = min(batch_tile, max(256, _round_up(-(-B // 4), 8)))
    grid = pl.cdiv(B, bt)   # ragged last tile: OOB rows masked on write

    const = lambda a: pl.BlockSpec(a.shape, lambda i: (0,) * a.ndim)
    out_dtype = w1p.dtype   # bf16 out on the bf16 path halves writeback bytes

    return pl.pallas_call(
        _mlp_kernel,
        out_shape=jax.ShapeDtypeStruct((B, Np), out_dtype),
        grid_spec=pltpu.PrefetchScalarGridSpec(
            num_scalar_prefetch=0,
            grid=(grid,),
            in_specs=[
                pl.BlockSpec((bt, K_IN), lambda i: (i, 0)),   # x tile, unpadded
                const(w1p), const(b1p),
                const(w2p), const(b2p),
                const(w3p), const(b3p),
            ],
            out_specs=pl.BlockSpec((bt, Np), lambda i: (i, 0)),
        ),
        compiler_params=pltpu.CompilerParams(
            dimension_semantics=("parallel",)),
    )(x2d, w1p, b1p, w2p, b2p, w3p, b3p)


def mlp_forward(x, prepared_params, *, batch_tile=1024):
    """Module-equivalent forward: (B, 10) logits.

    Note: the [:, :10] slice is an extra (small) XLA copy over the padded
    slab; latency-critical consumers should use mlp_forward_padded() and fuse
    the softmax/argmax/loss over the 10 valid lanes downstream instead."""
    return mlp_forward_padded(x, prepared_params, batch_tile=batch_tile)[:, :N_OUT]


def init_params(key, hiddens=32):
    """Deterministic init mimicking nn.Linear shapes (stored transposed)."""
    k1, k2, k3, k4, k5, k6 = jax.random.split(key, 6)

    def lin(kw, kb, fan_in, fan_out):
        bound = 1.0 / jnp.sqrt(fan_in)
        w = jax.random.uniform(kw, (fan_in, fan_out), jnp.float32, -bound, bound)
        b = jax.random.uniform(kb, (1, fan_out), jnp.float32, -bound, bound)
        return w, b

    w1, b1 = lin(k1, k2, 784, hiddens)
    w2, b2 = lin(k3, k4, hiddens, hiddens)
    w3, b3 = lin(k5, k6, hiddens, 10)
    return (w1, b1, w2, b2, w3, b3)


def _ref_forward(x2d, params, compute_dtype):
    """Plain-JAX reference with the same operand casting as the kernel."""
    w1, b1, w2, b2, w3, b3 = params
    c = lambda a: a.astype(compute_dtype)
    h = jnp.dot(c(x2d), c(w1), preferred_element_type=jnp.float32) + b1
    h = jnp.maximum(h, 0.0)
    h = jnp.dot(c(h), c(w2), preferred_element_type=jnp.float32) + b2
    h = jnp.maximum(h, 0.0)
    return jnp.dot(c(h), c(w3), preferred_element_type=jnp.float32) + b3


if __name__ == "__main__":
    key = jax.random.PRNGKey(0)
    kx, kp = jax.random.split(key)

    hiddens = 32
    batch = 8
    # MNIST-like input, NCHW (B, 1, 28, 28); forward flattens to (B, 784).
    x = jax.random.normal(kx, (batch, 1, 28, 28), dtype=jnp.float32)
    params = init_params(kp, hiddens)
    x2d = x.reshape(-1, K_IN)

    # f32-operand path: compare against the plain-JAX f32 reference.
    p_f32 = prepare_params(params, jnp.float32)
    out_f32 = jax.block_until_ready(mlp_forward(x, p_f32))
    assert out_f32.shape == (batch, 10)
    ref_f32 = _ref_forward(x2d, params, jnp.float32)
    assert jnp.allclose(out_f32.astype(jnp.float32), ref_f32,
                        atol=2e-2, rtol=2e-2)

    # bf16-operand / f32-accumulate / bf16-output path (MXU + bandwidth
    # friendly).  bf16 output loses ~3 decimal digits on the logits — fine for
    # argmax / softmax-CE — so the tolerance is relaxed accordingly.
    p_bf16 = prepare_params(params, jnp.bfloat16)
    out_bf16 = jax.block_until_ready(mlp_forward(x, p_bf16))
    assert out_bf16.shape == (batch, 10)
    ref_bf16 = _ref_forward(x2d, params, jnp.bfloat16)
    assert jnp.allclose(out_bf16.astype(jnp.float32), ref_bf16,
                        atol=3e-2, rtol=3e-2)

    print("KERNEL_OK")
</pallas_src>

<mosaic_0001>
module attributes {stable_mosaic.version = 11 : i64} {
  func.func @_mlp_kernel(%arg0: i32, %arg1: memref<8x784xf32, #tpu.memory_space<vmem>>, %arg2: memref<784x128xf32, #tpu.memory_space<vmem>>, %arg3: memref<1x128xf32, #tpu.memory_space<vmem>>, %arg4: memref<128x128xf32, #tpu.memory_space<vmem>>, %arg5: memref<1x128xf32, #tpu.memory_space<vmem>>, %arg6: memref<128x128xf32, #tpu.memory_space<vmem>>, %arg7: memref<1x128xf32, #tpu.memory_space<vmem>>, %arg8: memref<8x128xf32, #tpu.memory_space<vmem>>) attributes {dimension_semantics = [#tpu.dimension_semantics<parallel>], iteration_bounds = array<i64: 1>, scalar_prefetch = 0 : i64, scratch_operands = 0 : i64, tpu.core_type = #tpu.core_type<tc>, window_params = [{transform_indices = @transform_0, window_bounds = array<i64: 8, 784>}, {pipeline_mode = #tpu.pipeline_mode<synchronous>, transform_indices = @transform_1, window_bounds = array<i64: 784, 128>}, {pipeline_mode = #tpu.pipeline_mode<synchronous>, transform_indices = @transform_2, window_bounds = array<i64: 1, 128>}, {pipeline_mode = #tpu.pipeline_mode<synchronous>, transform_indices = @transform_3, window_bounds = array<i64: 128, 128>}, {pipeline_mode = #tpu.pipeline_mode<synchronous>, transform_indices = @transform_4, window_bounds = array<i64: 1, 128>}, {pipeline_mode = #tpu.pipeline_mode<synchronous>, transform_indices = @transform_5, window_bounds = array<i64: 128, 128>}, {pipeline_mode = #tpu.pipeline_mode<synchronous>, transform_indices = @transform_6, window_bounds = array<i64: 1, 128>}, {transform_indices = @transform_7, window_bounds = array<i64: 8, 128>}]} {
    %c0 = arith.constant 0 : index
    %c0_0 = arith.constant 0 : index
    %0 = vector.load %arg1[%c0, %c0_0] : memref<8x784xf32, #tpu.memory_space<vmem>>, vector<8x784xf32>
    %c0_1 = arith.constant 0 : index
    %c0_2 = arith.constant 0 : index
    %1 = vector.load %arg2[%c0_1, %c0_2] : memref<784x128xf32, #tpu.memory_space<vmem>>, vector<784x128xf32>
    %cst = arith.constant dense<0.000000e+00> : vector<8x128xf32>
    %2 = tpu.matmul %0, %1, %cst {dimension_numbers = #tpu.dot_dimension_numbers<[1], [0], [0], [1], [0, 0, 1, 1], [], []>} : vector<8x784xf32>, vector<784x128xf32>, vector<8x128xf32> -> vector<8x128xf32>
    %c0_3 = arith.constant 0 : index
    %c0_4 = arith.constant 0 : index
    %3 = vector.load %arg3[%c0_3, %c0_4] : memref<1x128xf32, #tpu.memory_space<vmem>>, vector<1x128xf32>
    %4 = vector.broadcast %3 : vector<1x128xf32> to vector<8x128xf32>
    %5 = arith.addf %2, %4 : vector<8x128xf32>
    %cst_5 = arith.constant 0.000000e+00 : f32
    %6 = vector.broadcast %cst_5 : f32 to vector<8x128xf32>
    %7 = arith.maximumf %5, %6 : vector<8x128xf32>
    %c0_6 = arith.constant 0 : index
    %c0_7 = arith.constant 0 : index
    %8 = vector.load %arg4[%c0_6, %c0_7] : memref<128x128xf32, #tpu.memory_space<vmem>>, vector<128x128xf32>
    %cst_8 = arith.constant dense<0.000000e+00> : vector<8x128xf32>
    %9 = tpu.matmul %7, %8, %cst_8 {dimension_numbers = #tpu.dot_dimension_numbers<[1], [0], [0], [1], [0, 0, 1, 1], [], []>} : vector<8x128xf32>, vector<128x128xf32>, vector<8x128xf32> -> vector<8x128xf32>
    %c0_9 = arith.constant 0 : index
    %c0_10 = arith.constant 0 : index
    %10 = vector.load %arg5[%c0_9, %c0_10] : memref<1x128xf32, #tpu.memory_space<vmem>>, vector<1x128xf32>
    %11 = vector.broadcast %10 : vector<1x128xf32> to vector<8x128xf32>
    %12 = arith.addf %9, %11 : vector<8x128xf32>
    %cst_11 = arith.constant 0.000000e+00 : f32
    %13 = vector.broadcast %cst_11 : f32 to vector<8x128xf32>
    %14 = arith.maximumf %12, %13 : vector<8x128xf32>
    %c0_12 = arith.constant 0 : index
    %c0_13 = arith.constant 0 : index
    %15 = vector.load %arg6[%c0_12, %c0_13] : memref<128x128xf32, #tpu.memory_space<vmem>>, vector<128x128xf32>
    %cst_14 = arith.constant dense<0.000000e+00> : vector<8x128xf32>
    %16 = tpu.matmul %14, %15, %cst_14 {dimension_numbers = #tpu.dot_dimension_numbers<[1], [0], [0], [1], [0, 0, 1, 1], [], []>} : vector<8x128xf32>, vector<128x128xf32>, vector<8x128xf32> -> vector<8x128xf32>
    %c0_15 = arith.constant 0 : index
    %c0_16 = arith.constant 0 : index
    %17 = vector.load %arg7[%c0_15, %c0_16] : memref<1x128xf32, #tpu.memory_space<vmem>>, vector<1x128xf32>
    %18 = vector.broadcast %17 : vector<1x128xf32> to vector<8x128xf32>
    %19 = arith.addf %16, %18 : vector<8x128xf32>
    %c0_17 = arith.constant 0 : index
    %c0_18 = arith.constant 0 : index
    %20 = vector.load %arg8[%c0_17, %c0_18] : memref<8x128xf32, #tpu.memory_space<vmem>>, vector<8x128xf32>
    tpu.vector_store %arg8[%c0_17, %c0_18], %19 {strides = array<i32>} : memref<8x128xf32, #tpu.memory_space<vmem>>, vector<8x128xf32>,
    return
  }
  func.func @transform_0(%arg0: i32) -> (i32, i32) {
    %c0_i32 = arith.constant 0 : i32
    %c0_i32_0 = arith.constant 0 : i32
    return %arg0, %c0_i32 : i32, i32
  }
  func.func @transform_1(%arg0: i32) -> (i32, i32) {
    %c0_i32 = arith.constant 0 : i32
    %c0_i32_0 = arith.constant 0 : i32
    %c0_i32_1 = arith.constant 0 : i32
    return %c0_i32, %c0_i32_0 : i32, i32
  }
  func.func @transform_2(%arg0: i32) -> (i32, i32) {
    %c0_i32 = arith.constant 0 : i32
    %c0_i32_0 = arith.constant 0 : i32
    %c0_i32_1 = arith.constant 0 : i32
    return %c0_i32, %c0_i32_0 : i32, i32
  }
  func.func @transform_3(%arg0: i32) -> (i32, i32) {
    %c0_i32 = arith.constant 0 : i32
    %c0_i32_0 = arith.constant 0 : i32
    %c0_i32_1 = arith.constant 0 : i32
    return %c0_i32, %c0_i32_0 : i32, i32
  }
  func.func @transform_4(%arg0: i32) -> (i32, i32) {
    %c0_i32 = arith.constant 0 : i32
    %c0_i32_0 = arith.constant 0 : i32
    %c0_i32_1 = arith.constant 0 : i32
    return %c0_i32, %c0_i32_0 : i32, i32
  }
  func.func @transform_5(%arg0: i32) -> (i32, i32) {
    %c0_i32 = arith.constant 0 : i32
    %c0_i32_0 = arith.constant 0 : i32
    %c0_i32_1 = arith.constant 0 : i32
    return %c0_i32, %c0_i32_0 : i32, i32
  }
  func.func @transform_6(%arg0: i32) -> (i32, i32) {
    %c0_i32 = arith.constant 0 : i32
    %c0_i32_0 = arith.constant 0 : i32
    %c0_i32_1 = arith.constant 0 : i32
    return %c0_i32, %c0_i32_0 : i32, i32
  }
  func.func @transform_7(%arg0: i32) -> (i32, i32) {
    %c0_i32 = arith.constant 0 : i32
    %c0_i32_0 = arith.constant 0 : i32
    return %arg0, %c0_i32 : i32, i32
  }
}

</mosaic_0001>

<bundles_post_ra>
// kernel: mlp_forward_padded.1
= control target key start
LH: loop header
LB: loop body
LE: loop exit
PB: predicated region body
PF: predicated region fallthrough
CT: control target
= control target key end

     0   :  { %12 = vsyncpa [#allocation3], 0  ;;  %s1534_s0 = inlined_call_operand.vmem [shape: f32[8,784], index: 0, kind: input, shape index: {}]   ;;  %s1535_s1 = inlined_call_operand.vmem [shape: f32[784,128], index: 1, kind: input, shape index: {}]   ;;  %s1536_s2 = inlined_call_operand.vmem [shape: f32[1,128], index: 2, kind: input, shape index: {}]   ;;  %s1537_s3 = inlined_call_operand.hbm [shape: f32[128,128], index: 3, kind: input, shape index: {}]   ;;  %s1538_s4 = inlined_call_operand.vmem [shape: f32[1,128], index: 4, kind: input, shape index: {}]   ;;  %s1539_s5 = inlined_call_operand.hbm [shape: f32[128,128], index: 5, kind: input, shape index: {}]   ;;  %s1540_s6 = inlined_call_operand.vmem [shape: f32[1,128], index: 6, kind: input, shape index: {}]   ;;  %s1541_s7 = inlined_call_operand.hbm [shape: f32[8,128], index: 7, kind: output, shape index: {}]  }
   0x1   :  { %13 = vsyncpa [#allocation6], 0 }
   0x2   :  { %14 = vsyncpa [#allocation4], 0  ;;  %s1106_s24 = smov [#allocation2]   ;;  %s1034_s28 = scalar_lea.hbm %s1537_s3, 2048 }
   0x3   :  { %s26_s25 = sshll.u32 %s1106_s24, 4  ;;  %p1035_p0 = scmp.ne.s32.totalorder %s1537_s3, %s1034_s28  ;;  %s27_s25 = int_to_ptr.vmem [resolvable:$true] %s26_s25 }
   0x4   :  { %p1038_p1 = scmp.lt.u32.totalorder %s1034_s28, %s1537_s3 }
   0x6   :  { %p1040_p2 = pnand %p1038_p1, %p1035_p0 }
   0x8   :  { %1043 = shalt.err (!%p1040_p2)
}
   0x9   :  { %s1044_s10 = scalar_lea.vmem %s27_s25, 2048  ;;  %p1049_p4 = scmp.lt.s32.totalorder %s27_s25, %s27_s25 }
   0xa   :  { %p1045_p3 = scmp.ne.s32.totalorder %s27_s25, %s1044_s10  ;;  %p1050_p5 = scmp.lt.s32.totalorder %s1044_s10, %s1044_s10 }
   0xc   :  { %p1051_p6 = por %p1050_p5, %p1049_p4 }
   0xe   :  { %p1052_p7 = pnand %p1051_p6, %p1045_p3 }
  0x10   :  { %1055 = shalt.err (!%p1052_p7)
}
  0x11   :  { %s1107_s11 = smov 128   ;;  %s1108_s12 = smov 8  }
  0x12   :  { %32 = dma.hbm_to_vmem [thread:$0]  %s1537_s3, 2048, %s27_s25, [#allocation3], %s1107_s11, %s1107_s11, %s1108_s12  }
  0x13   :  { %s1109_s15 = smov [#allocation5]   ;;  %s1056_s19 = scalar_lea.hbm %s1539_s5, 2048 }
  0x14   :  { %s40_s16 = sshll.u32 %s1109_s15, 4  ;;  %p1057_p8 = scmp.ne.s32.totalorder %s1539_s5, %s1056_s19  ;;  %s41_s16 = int_to_ptr.vmem [resolvable:$true] %s40_s16 }
  0x15   :  { %p1060_p9 = scmp.lt.u32.totalorder %s1056_s19, %s1539_s5 }
  0x17   :  { %p1062_p10 = pnand %p1060_p9, %p1057_p8 }
  0x19   :  { %1065 = shalt.err (!%p1062_p10)
}
  0x1a   :  { %s1066_s24 = scalar_lea.vmem %s41_s16, 2048  ;;  %p1071_p12 = scmp.lt.s32.totalorder %s41_s16, %s41_s16 }
  0x1b   :  { %p1067_p11 = scmp.ne.s32.totalorder %s41_s16, %s1066_s24  ;;  %p1072_p13 = scmp.lt.s32.totalorder %s1066_s24, %s1066_s24 }
  0x1d   :  { %p1073_p0 = por %p1072_p13, %p1071_p12 }
  0x1f   :  { %p1074_p1 = pnand %p1073_p0, %p1067_p11 }
  0x21   :  { %1077 = shalt.err (!%p1074_p1)
}
  0x22   :  { %46 = dma.hbm_to_vmem [thread:$0]  %s1539_s5, 2048, %s41_s16, [#allocation6], %s1107_s11, %s1107_s11, %s1108_s12  }
  0x23   :  { %1100 = dma.done.wait [#allocation3], 2048  }
  0x24   :  { %1101 = vsyncadd [#allocation3], 4294965248 }
  0x25   :  { %1102 = dma.done.wait [#allocation6], 2048  }
  0x26   :  { %1103 = vsyncadd [#allocation6], 4294965248  ;;  %v78_v0 = vld [vmem:[%s1535_s1 + $0x80] sm:$0xff]  ;;  %v79_v1 = vld [vmem:[%s1535_s1 + $0x88] sm:$0xff]  ;;  %vm1111_vm0 = vmmov 0   ;;  %vm167_vm1 = vcmask 130048  }
  0x27   :  { %v62_v2 = vld [vmem:[%s1535_s1] sm:$0xff]  ;;  %v879_v3 = vpack.c.bf16 %v79_v1, %v78_v0  ;;  %v63_v4 = vld [vmem:[%s1535_s1 + $0x8] sm:$0xff]  ;;  %v80_v11 = vld [vmem:[%s1535_s1 + $0x90] sm:$0xff]  ;;  %s1113_s15 = smov [#allocation7]  }
  0x28   :  { %v110_v5 = vld [vmem:[%s1535_s1 + $0x180] sm:$0xff]  ;;  %v111_v6 = vld [vmem:[%s1535_s1 + $0x188] sm:$0xff]  ;;  %v881_v7 = vpack.c.bf16 %v63_v4, %v62_v2  ;;  %v81_v13 = vld [vmem:[%s1535_s1 + $0x98] sm:$0xff]  ;;  %s646_s16 = sshll.u32 %s1113_s15, 4  ;;  %s647_s16 = int_to_ptr.vmem [resolvable:$true] %s646_s16 }
  0x29   :  { %v911_v8 = vpack.c.bf16 %v111_v6, %v110_v5  ;;  %v94_v9 = vld [vmem:[%s1535_s1 + $0x100] sm:$0xff]  ;;  %v95_v10 = vld [vmem:[%s1535_s1 + $0x108] sm:$0xff]  ;;  %880 = vmatprep.subr.bf16.mxu0 %v879_v3  ;;  %v64_v14 = vld [vmem:[%s1535_s1 + $0x10] sm:$0xff]  ;;  %v883_v16 = vpack.c.bf16 %v81_v13, %v80_v11  ;;  %s1078_s17 = scalar_lea.vmem %s647_s16, 128  ;;  %p1083_p3 = scmp.lt.s32.totalorder %s647_s16, %s647_s16 }
  0x2a   :  { %v913_v12 = vpack.c.bf16 %v95_v10, %v94_v9  ;;  %v65_v15 = vld [vmem:[%s1535_s1 + $0x18] sm:$0xff]  ;;  %882 = vmatpush3.bf16.msra.mxu0 %v881_v7  ;;  %v112_v18 = vld [vmem:[%s1535_s1 + $0x190] sm:$0xff]  ;;  %v82_v23 = vld [vmem:[%s1535_s1 + $0xa0] sm:$0xff]  ;;  %p1079_p2 = scmp.ne.s32.totalorder %s647_s16, %s1078_s17  ;;  %p1084_p4 = scmp.lt.s32.totalorder %s1078_s17, %s1078_s17 }
  0x2b   :  { %912 = vmatprep.subr.bf16.mxu1 %v911_v8  ;;  %v885_v17 = vpack.c.bf16 %v65_v15, %v64_v14  ;;  %v113_v19 = vld [vmem:[%s1535_s1 + $0x198] sm:$0xff]  ;;  %v96_v20 = vld [vmem:[%s1535_s1 + $0x110] sm:$0xff]  ;;  %v83_v24 = vld [vmem:[%s1535_s1 + $0xa8] sm:$0xff]  ;;  %884 = vmatprep.subr.bf16.mxu0 %v883_v16 }
  0x2c   :  { %914 = vmatpush3.bf16.msra.mxu1 %v913_v12  ;;  %v915_v21 = vpack.c.bf16 %v113_v19, %v112_v18  ;;  %v97_v22 = vld [vmem:[%s1535_s1 + $0x118] sm:$0xff]  ;;  %v887_v26 = vpack.c.bf16 %v83_v24, %v82_v23  ;;  %v66_v27 = vld [vmem:[%s1535_s1 + $0x20] sm:$0xff]  ;;  %v67_v28 = vld [vmem:[%s1535_s1 + $0x28] sm:$0xff]  ;;  %p1085_p5 = por %p1084_p4, %p1083_p3 }
  0x2d   :  { %v917_v25 = vpack.c.bf16 %v97_v22, %v96_v20  ;;  %v114_v29 = vld [vmem:[%s1535_s1 + $0x1a0] sm:$0xff]  ;;  %v115_v30 = vld [vmem:[%s1535_s1 + $0x1a8] sm:$0xff]  ;;  %v889_v33 = vpack.c.bf16 %v67_v28, %v66_v27  ;;  %v84_v35 = vld [vmem:[%s1535_s1 + $0xb0] sm:$0xff] }
  0x2e   :  { %916 = vmatprep.subr.bf16.mxu1 %v915_v21  ;;  %v98_v31 = vld [vmem:[%s1535_s1 + $0x120] sm:$0xff]  ;;  %v99_v32 = vld [vmem:[%s1535_s1 + $0x128] sm:$0xff]  ;;  %886 = vmatpush3.bf16.msra.mxu0 %v885_v17  ;;  %v919_v34 = vpack.c.bf16 %v115_v30, %v114_v29  ;;  %v85_v36 = vld [vmem:[%s1535_s1 + $0xb8] sm:$0xff]  ;;  %p1086_p6 = pnand %p1085_p5, %p1079_p2 }
  0x2f   :  { %v68_v37 = vld [vmem:[%s1535_s1 + $0x30] sm:$0xff]  ;;  %888 = vmatprep.subr.bf16.mxu0 %v887_v26  ;;  %v921_v38 = vpack.c.bf16 %v99_v32, %v98_v31  ;;  %v891_v39 = vpack.c.bf16 %v85_v36, %v84_v35  ;;  %v69_v40 = vld [vmem:[%s1535_s1 + $0x38] sm:$0xff]  ;;  %v86_v46 = vld [vmem:[%s1535_s1 + $0xc0] sm:$0xff] }
  0x30   :  { %918 = vmatpush3.bf16.msra.mxu1 %v917_v25  ;;  %v116_v41 = vld [vmem:[%s1535_s1 + $0x1b0] sm:$0xff]  ;;  %v117_v42 = vld [vmem:[%s1535_s1 + $0x1b8] sm:$0xff]  ;;  %v87_v47 = vld [vmem:[%s1535_s1 + $0xc8] sm:$0xff]  ;;  %v893_v48 = vpack.c.bf16 %v69_v40, %v68_v37 }
  0x31   :  { %920 = vmatprep.subr.bf16.mxu1 %v919_v34  ;;  %v923_v43 = vpack.c.bf16 %v117_v42, %v116_v41  ;;  %v100_v44 = vld [vmem:[%s1535_s1 + $0x130] sm:$0xff]  ;;  %v101_v45 = vld [vmem:[%s1535_s1 + $0x138] sm:$0xff]  ;;  %v118_v49 = vld [vmem:[%s1535_s1 + $0x1c0] sm:$0xff]  ;;  %v895_v52 = vpack.c.bf16 %v87_v47, %v86_v46 }
  0x32   :  { %890 = vmatpush3.bf16.msra.mxu0 %v889_v33  ;;  %v119_v50 = vld [vmem:[%s1535_s1 + $0x1c8] sm:$0xff]  ;;  %v925_v51 = vpack.c.bf16 %v101_v45, %v100_v44  ;;  %v70_v53 = vld [vmem:[%s1535_s1 + $0x40] sm:$0xff]  ;;  %v88_v58 = vld [vmem:[%s1535_s1 + $0xd0] sm:$0xff] }
  0x33   :  { %892 = vmatprep.subr.bf16.mxu0 %v891_v39  ;;  %v71_v54 = vld [vmem:[%s1535_s1 + $0x48] sm:$0xff]  ;;  %v102_v55 = vld [vmem:[%s1535_s1 + $0x140] sm:$0xff]  ;;  %v927_v56 = vpack.c.bf16 %v119_v50, %v118_v49  ;;  %v89_v59 = vld [vmem:[%s1535_s1 + $0xd8] sm:$0xff]  ;;  %v1110_v50 = vmov 0.0|0.0  }
  0x34   :  { %922 = vmatpush3.bf16.msra.mxu1 %v921_v38  ;;  %v103_v57 = vld [vmem:[%s1535_s1 + $0x148] sm:$0xff]  ;;  %v120_v60 = vld [vmem:[%s1535_s1 + $0x1d0] sm:$0xff]  ;;  %v121_v61 = vld [vmem:[%s1535_s1 + $0x1d8] sm:$0xff]  ;;  %v897_v62 = vpack.c.bf16 %v71_v54, %v70_v53  ;;  %v899_v0 = vpack.c.bf16 %v89_v59, %v88_v58 }
  0x35   :  { %924 = vmatprep.subr.bf16.mxu1 %v923_v43  ;;  %v929_v63 = vpack.c.bf16 %v103_v57, %v102_v55  ;;  %v72_v1 = vld [vmem:[%s1535_s1 + $0x50] sm:$0xff]  ;;  %v73_v2 = vld [vmem:[%s1535_s1 + $0x58] sm:$0xff]  ;;  %v931_v4 = vpack.c.bf16 %v121_v61, %v120_v60  ;;  %v90_v6 = vld [vmem:[%s1535_s1 + $0xe0] sm:$0xff]  ;;  %v1112_v60 = vmov 0.0  }
  0x36   :  { %894 = vmatpush3.bf16.msra.mxu0 %v893_v48  ;;  %v104_v3 = vld [vmem:[%s1535_s1 + $0x150] sm:$0xff]  ;;  %v105_v5 = vld [vmem:[%s1535_s1 + $0x158] sm:$0xff]  ;;  %v91_v7 = vld [vmem:[%s1535_s1 + $0xe8] sm:$0xff]  ;;  %v901_v10 = vpack.c.bf16 %v73_v2, %v72_v1 }
  0x37   :  { %896 = vmatprep.subr.bf16.mxu0 %v895_v52  ;;  %v122_v8 = vld [vmem:[%s1535_s1 + $0x1e0] sm:$0xff]  ;;  %v123_v9 = vld [vmem:[%s1535_s1 + $0x1e8] sm:$0xff]  ;;  %v933_v13 = vpack.c.bf16 %v105_v5, %v104_v3  ;;  %v903_v14 = vpack.c.bf16 %v91_v7, %v90_v6  ;;  %v92_v19 = vld [vmem:[%s1535_s1 + $0xf0] sm:$0xff] }
  0x38   :  { %926 = vmatpush3.bf16.msra.mxu1 %v925_v51  ;;  %v74_v11 = vld [vmem:[%s1535_s1 + $0x60] sm:$0xff]  ;;  %v56_v12 = vld [vmem:[%s1534_s0 + $0x8] sm:$0xff]  ;;  %v935_v18 = vpack.c.bf16 %v123_v9, %v122_v8  ;;  %v93_v20 = vld [vmem:[%s1535_s1 + $0xf8] sm:$0xff] }
  0x39   :  { %928 = vmatprep.subr.bf16.mxu1 %v927_v56  ;;  %v75_v15 = vld [vmem:[%s1535_s1 + $0x68] sm:$0xff]  ;;  %v106_v16 = vld [vmem:[%s1535_s1 + $0x160] sm:$0xff]  ;;  %235 = vmatprep.mubr.f32.mxu0 %v56_v12  ;;  %v58_v21 = vld [vmem:[%s1534_s0 + $0x18] sm:$0xff]  ;;  %v907_v26 = vpack.c.bf16 %v93_v20, %v92_v19 }
  0x3a   :  { %898 = vmatpush3.bf16.msra.mxu0 %v897_v62  ;;  %v107_v17 = vld [vmem:[%s1535_s1 + $0x168] sm:$0xff]  ;;  %v124_v22 = vld [vmem:[%s1535_s1 + $0x1f0] sm:$0xff]  ;;  %v125_v23 = vld [vmem:[%s1535_s1 + $0x1f8] sm:$0xff]  ;;  %305 = vmatprep.mubr.f32.mxu1 %v58_v21  ;;  %v905_v24 = vpack.c.bf16 %v75_v15, %v74_v11 }
  0x3b   :  { %900 = vmatprep.subr.bf16.mxu0 %v899_v0  ;;  %v937_v25 = vpack.c.bf16 %v107_v17, %v106_v16  ;;  %v76_v27 = vld [vmem:[%s1535_s1 + $0x70] sm:$0xff]  ;;  %v77_v28 = vld [vmem:[%s1535_s1 + $0x78] sm:$0xff]  ;;  %v939_v30 = vpack.c.bf16 %v125_v23, %v124_v22  ;;  %v142_v32 = vld [vmem:[%s1535_s1 + $0x280] sm:$0xff] }
  0x3c   :  { %930 = vmatpush3.bf16.msra.mxu1 %v929_v63  ;;  %v108_v29 = vld [vmem:[%s1535_s1 + $0x170] sm:$0xff]  ;;  %v109_v31 = vld [vmem:[%s1535_s1 + $0x178] sm:$0xff]  ;;  %v143_v33 = vld [vmem:[%s1535_s1 + $0x288] sm:$0xff]  ;;  %v909_v34 = vpack.c.bf16 %v77_v28, %v76_v27 }
  0x3d   :  { %932 = vmatprep.subr.bf16.mxu1 %v931_v4  ;;  %v941_v35 = vpack.c.bf16 %v109_v31, %v108_v29  ;;  %v943_v36 = vpack.c.bf16 %v143_v33, %v142_v32  ;;  %v126_v37 = vld [vmem:[%s1535_s1 + $0x200] sm:$0xff]  ;;  %v127_v38 = vld [vmem:[%s1535_s1 + $0x208] sm:$0xff]  ;;  %v144_v39 = vld [vmem:[%s1535_s1 + $0x290] sm:$0xff] }
  0x3e   :  { %902 = vmatpush3.bf16.msra.mxu0 %v901_v10  ;;  %v145_v40 = vld [vmem:[%s1535_s1 + $0x298] sm:$0xff]  ;;  %v55_v41 = vld [vmem:[%s1534_s0] sm:$0xff]  ;;  %v945_v42 = vpack.c.bf16 %v127_v38, %v126_v37  ;;  %v57_v43 = vld [vmem:[%s1534_s0 + $0x10] sm:$0xff] }
  0x3f   :  { %904 = vmatprep.subr.bf16.mxu0 %v903_v14  ;;  %v128_v44 = vld [vmem:[%s1535_s1 + $0x210] sm:$0xff]  ;;  %v947_v45 = vpack.c.bf16 %v145_v40, %v144_v39  ;;  %v129_v46 = vld [vmem:[%s1535_s1 + $0x218] sm:$0xff]  ;;  %v146_v47 = vld [vmem:[%s1535_s1 + $0x2a0] sm:$0xff] }
  0x40   :  { %934 = vmatpush3.bf16.msra.mxu1 %v933_v13  ;;  %v147_v48 = vld [vmem:[%s1535_s1 + $0x2a8] sm:$0xff]  ;;  %v158_v51 = vld [vmem:[%s1535_s1 + $0x300] sm:$0xff]  ;;  %v949_v54 = vpack.c.bf16 %v129_v46, %v128_v44  ;;  %v148_v58 = vld [vmem:[%s1535_s1 + $0x2b0] sm:$0xff] }
  0x41   :  { %936 = vmatprep.subr.bf16.mxu1 %v935_v18  ;;  %v60_v49 = vld [vmem:[%s1534_s0 + $0x28] sm:$0xff]  ;;  %v951_v55 = vpack.c.bf16 %v147_v48, %v146_v47  ;;  %v130_v56 = vld [vmem:[%s1535_s1 + $0x220] sm:$0xff]  ;;  %v149_v59 = vld [vmem:[%s1535_s1 + $0x2b8] sm:$0xff] }
  0x42   :  { %906 = vmatpush3.bf16.msra.mxu0 %v905_v24  ;;  %v159_v52 = vld [vmem:[%s1535_s1 + $0x308] sm:$0xff]  ;;  %v61_v61 = vld [vmem:[%s1534_s0 + $0x30] sm:$0xff]  ;;  %v955_v63 = vpack.c.bf16 %v149_v59, %v148_v58  ;;  %v133_v1 = vld [vmem:[%s1535_s1 + $0x238] sm:$0xff] }
  0x43   :  { %908 = vmatprep.subr.bf16.mxu0 %v907_v26  ;;  %v976_v53 = vpack.c.bf16 %v159_v52, %v158_v51  ;;  %v131_v57 = vld [vmem:[%s1535_s1 + $0x228] sm:$0xff]  ;;  %v132_v0 = vld [vmem:[%s1535_s1 + $0x230] sm:$0xff]  ;;  %v150_v2 = vld [vmem:[%s1535_s1 + $0x2c0] sm:$0xff] }
  0x44   :  { %938 = vmatpush3.bf16.msra.mxu1 %v937_v25  ;;  %v953_v62 = vpack.c.bf16 %v131_v57, %v130_v56  ;;  %v151_v3 = vld [vmem:[%s1535_s1 + $0x2c8] sm:$0xff]  ;;  %v957_v4 = vpack.c.bf16 %v133_v1, %v132_v0  ;;  %v134_v6 = vld [vmem:[%s1535_s1 + $0x240] sm:$0xff]  ;;  %v152_v8 = vld [vmem:[%s1535_s1 + $0x2d0] sm:$0xff] }
  0x45   :  { %940 = vmatprep.subr.bf16.mxu1 %v939_v30  ;;  %v959_v5 = vpack.c.bf16 %v151_v3, %v150_v2  ;;  %v135_v7 = vld [vmem:[%s1535_s1 + $0x248] sm:$0xff]  ;;  %v153_v9 = vld [vmem:[%s1535_s1 + $0x2d8] sm:$0xff]  ;;  %v136_v12 = vld [vmem:[%s1535_s1 + $0x250] sm:$0xff] }
  0x46   :  { %910 = vmatpush3.bf16.msra.mxu0 %v909_v34  ;;  %v961_v10 = vpack.c.bf16 %v135_v7, %v134_v6  ;;  %v963_v11 = vpack.c.bf16 %v153_v9, %v152_v8  ;;  %v137_v13 = vld [vmem:[%s1535_s1 + $0x258] sm:$0xff]  ;;  %v154_v14 = vld [vmem:[%s1535_s1 + $0x2e0] sm:$0xff]  ;;  %v155_v15 = vld [vmem:[%s1535_s1 + $0x2e8] sm:$0xff] }
  0x47   :  { %944 = vmatprep.subr.bf16.mxu0 %v943_v36  ;;  %v965_v16 = vpack.c.bf16 %v137_v13, %v136_v12  ;;  %v967_v17 = vpack.c.bf16 %v155_v15, %v154_v14  ;;  %v138_v18 = vld [vmem:[%s1535_s1 + $0x260] sm:$0xff]  ;;  %v139_v19 = vld [vmem:[%s1535_s1 + $0x268] sm:$0xff]  ;;  %v156_v20 = vld [vmem:[%s1535_s1 + $0x2f0] sm:$0xff] }
  0x48   :  { %942 = vmatpush3.bf16.msra.mxu1 %v941_v35  ;;  %v157_v21 = vld [vmem:[%s1535_s1 + $0x2f8] sm:$0xff]  ;;  %v969_v22 = vpack.c.bf16 %v139_v19, %v138_v18  ;;  %v140_v24 = vld [vmem:[%s1535_s1 + $0x270] sm:$0xff]  ;;  %v59_v27 = vld [vmem:[%s1534_s0 + $0x20] sm:$0xff] }
  0x49   :  { %975 = vmatprep.subr.bf16.mxu1 %v1110_v50  ;;  %236 = vmatmul.mubr.f32.vlgmr.msra.gmra.mrb[0].mxu0 %v55_v41  ;;  %v971_v23 = vpack.c.bf16 %v157_v21, %v156_v20  ;;  %v141_v25 = vld [vmem:[%s1535_s1 + $0x278] sm:$0xff]  ;;  %v452_v28 = vld [vmem:[#allocation2] sm:$0xff]  ;;  %v454_v30 = vld [vmem:[#allocation2 + $0x10] sm:$0xff] }
  0x4a   :  { %946 = vmatpush3.bf16.msra.mxu0 %v945_v42  ;;  %375 = vmatprep.mubr.f32.mxu0 %v60_v49  ;;  %v973_v26 = vpack.c.bf16 %v141_v25, %v140_v24  ;;  %v453_v29 = vld [vmem:[#allocation2 + $0x8] sm:$0xff]  ;;  %v455_v32 = vld [vmem:[#allocation2 + $0x18] sm:$0xff]  ;;  %v456_v34 = vld [vmem:[#allocation2 + $0x20] sm:$0xff] }
  0x4b   :  { %306 = vmatmul.mubr.f32.vlgmr.msra.gmra.mrb[0].mxu1 %v57_v43  ;;  %948 = vmatprep.subr.bf16.mxu0 %v947_v45  ;;  %v979_v31 = vpack.c.bf16 %v453_v29, %v452_v28  ;;  %v982_v33 = vpack.c.bf16 %v455_v32, %v454_v30  ;;  %v457_v35 = vld [vmem:[#allocation2 + $0x28] sm:$0xff]  ;;  %v458_v37 = vld [vmem:[#allocation2 + $0x30] sm:$0xff]  ;;  %v459_v38 = vld [vmem:[#allocation2 + $0x38] sm:$0xff] }
  0x4c   :  { %977 = vmatpush3.bf16.msra.mxu1 %v976_v53  ;;  %806 = vmatprep.mubr.msk.f32.mxu1 %vm1111_vm0, %v1112_v60  ;;  %v985_v36 = vpack.c.bf16 %v457_v35, %v456_v34  ;;  %v988_v39 = vpack.c.bf16 %v459_v38, %v458_v37  ;;  %v460_v40 = vld [vmem:[#allocation2 + $0x40] sm:$0xff]  ;;  %v461_v41 = vld [vmem:[#allocation2 + $0x48] sm:$0xff]  ;;  %v462_v43 = vld [vmem:[#allocation2 + $0x50] sm:$0xff] }
  0x4d   :  { %978 = vmatprep.subr.bf16.mxu1 %v1110_v50  ;;  %v991_v42 = vpack.c.bf16 %v461_v41, %v460_v40  ;;  %v463_v44 = vld [vmem:[#allocation2 + $0x58] sm:$0xff]  ;;  %v464_v46 = vld [vmem:[#allocation2 + $0x60] sm:$0xff]  ;;  %v465_v47 = vld [vmem:[#allocation2 + $0x68] sm:$0xff] }
  0x4e   :  { %950 = vmatpush3.bf16.msra.mxu0 %v949_v54  ;;  %v994_v45 = vpack.c.bf16 %v463_v44, %v462_v43  ;;  %v997_v48 = vpack.c.bf16 %v465_v47, %v464_v46  ;;  %v466_v49 = vld [vmem:[#allocation2 + $0x70] sm:$0xff]  ;;  %v467_v51 = vld [vmem:[#allocation2 + $0x78] sm:$0xff]  ;;  %v546_v53 = vld [vmem:[#allocation5] sm:$0xff] }
  0x4f   :  { %952 = vmatprep.subr.bf16.mxu0 %v951_v55  ;;  %807 = vmatmul.mubr.msk.f32.vlgmr.msra.gmra.mrb[2].mxu1 %vm167_vm1, %v61_v61  ;;  %v1000_v52 = vpack.c.bf16 %v467_v51, %v466_v49  ;;  %v547_v54 = vld [vmem:[#allocation5 + $0x8] sm:$0xff]  ;;  %v548_v55 = vld [vmem:[#allocation5 + $0x10] sm:$0xff]  ;;  %v549_v57 = vld [vmem:[#allocation5 + $0x18] sm:$0xff] }
  0x50   :  { %841 = vmatprep.mubr.msk.f32.mxu1 %vm1111_vm0, %v1112_v60  ;;  %980 = vmatpush3.bf16.msra.mxu1 %v979_v31  ;;  %v1003_v56 = vpack.c.bf16 %v547_v54, %v546_v53  ;;  %v1006_v58 = vpack.c.bf16 %v549_v57, %v548_v55  ;;  %v550_v59 = vld [vmem:[#allocation5 + $0x20] sm:$0xff]  ;;  %v555_v2 = vld [vmem:[#allocation5 + $0x48] sm:$0xff]  ;;  %v658_v29 = vld [vmem:[%s1538_s4] ss:$0 sm:$0xff] }
  0x51   :  { %981 = vmatprep.subr.bf16.mxu1 %v1110_v50  ;;  %v554_v1 = vld [vmem:[#allocation5 + $0x40] sm:$0xff]  ;;  %v559_v8 = vld [vmem:[#allocation5 + $0x68] sm:$0xff]  ;;  %v659_v34 = vld [vmem:[%s1540_s6] ss:$0 sm:$0xff] }
  0x52   :  { %954 = vmatpush3.bf16.msra.mxu0 %v953_v62  ;;  %v552_v62 = vld [vmem:[#allocation5 + $0x30] sm:$0xff]  ;;  %v1015_v3 = vpack.c.bf16 %v555_v2, %v554_v1  ;;  %v558_v7 = vld [vmem:[#allocation5 + $0x60] sm:$0xff] }
  0x53   :  { %956 = vmatprep.subr.bf16.mxu0 %v955_v63  ;;  %v553_v63 = vld [vmem:[#allocation5 + $0x38] sm:$0xff]  ;;  %v1021_v9 = vpack.c.bf16 %v559_v8, %v558_v7 }
  0x54   :  { %983 = vmatpush3.bf16.msra.mxu1 %v982_v33  ;;  %v1012_v0 = vpack.c.bf16 %v553_v63, %v552_v62 }
  0x55   :  { %984 = vmatprep.subr.bf16.mxu1 %v1110_v50 }
  0x56   :  { %958 = vmatpush3.bf16.msra.mxu0 %v957_v4  ;;  %v556_v4 = vld [vmem:[#allocation5 + $0x50] sm:$0xff] }
  0x57   :  { %960 = vmatprep.subr.bf16.mxu0 %v959_v5  ;;  %v557_v5 = vld [vmem:[#allocation5 + $0x58] sm:$0xff] }
  0x58   :  { %986 = vmatpush3.bf16.msra.mxu1 %v985_v36  ;;  %v1018_v6 = vpack.c.bf16 %v557_v5, %v556_v4 }
  0x59   :  { %987 = vmatprep.subr.bf16.mxu1 %v1110_v50 }
  0x5a   :  { %962 = vmatpush3.bf16.msra.mxu0 %v961_v10 }
  0x5b   :  { %964 = vmatprep.subr.bf16.mxu0 %v963_v11  ;;  %v656_v11 = vld [vmem:[%s1536_s2] ss:$0 sm:$0xff] }
  0x5c   :  { %989 = vmatpush3.bf16.msra.mxu1 %v988_v39 }
  0x5d   :  { %990 = vmatprep.subr.bf16.mxu1 %v1110_v50 }
  0x5e   :  { %966 = vmatpush3.bf16.msra.mxu0 %v965_v16 }
  0x5f   :  { %968 = vmatprep.subr.bf16.mxu0 %v967_v17 }
  0x60   :  { %992 = vmatpush3.bf16.msra.mxu1 %v991_v42 }
  0x61   :  { %993 = vmatprep.subr.bf16.mxu1 %v1110_v50 }
  0x62   :  { %970 = vmatpush3.bf16.msra.mxu0 %v969_v22 }
  0x63   :  { %972 = vmatprep.subr.bf16.mxu0 %v971_v23 }
  0x64   :  { %995 = vmatpush3.bf16.msra.mxu1 %v994_v45 }
  0x65   :  { %996 = vmatprep.subr.bf16.mxu1 %v1110_v50 }
  0x66   :  { %974 = vmatpush3.bf16.msra.mxu0 %v973_v26  ;;  %v560_v26 = vld [vmem:[#allocation5 + $0x70] sm:$0xff] }
  0x67   :  { %1002 = vmatprep.subr.bf16.mxu0 %v1110_v50 }
  0x68   :  { %998 = vmatpush3.bf16.msra.mxu1 %v997_v48 }
  0x69   :  { %376 = vmatmul.mubr.f32.vlgmr.msra.gmra.mrb[2].mxu0 %v59_v27  ;;  %999 = vmatprep.subr.bf16.mxu1 %v1110_v50  ;;  %v561_v27 = vld [vmem:[#allocation5 + $0x78] sm:$0xff] }
  0x6a   :  { %876 = vmatprep.mubr.msk.f32.mxu0 %vm1111_vm0, %v1112_v60  ;;  %1004 = vmatpush3.bf16.msra.mxu0 %v1003_v56  ;;  %v551_v60 = vld [vmem:[#allocation5 + $0x28] sm:$0xff]  ;;  %v1024_v28 = vpack.c.bf16 %v561_v27, %v560_v26 }
  0x6b   :  { %1005 = vmatprep.subr.bf16.mxu0 %v1110_v50  ;;  %v1009_v61 = vpack.c.bf16 %v551_v60, %v550_v59 }
  0x6c   :  { %1001 = vmatpush3.bf16.msra.mxu1 %v1000_v52 }
  0x6e   :  { %1007 = vmatpush3.bf16.msra.mxu0 %v1006_v58 }
  0x6f   :  { %1008 = vmatprep.subr.bf16.mxu0 %v1110_v50 }
  0x72   :  { %1010 = vmatpush3.bf16.msra.mxu0 %v1009_v61 }
  0x73   :  { %1011 = vmatprep.subr.bf16.mxu0 %v1110_v50 }
  0x76   :  { %1013 = vmatpush3.bf16.msra.mxu0 %v1012_v0 }
  0x77   :  { %1014 = vmatprep.subr.bf16.mxu0 %v1110_v50 }
  0x7a   :  { %1016 = vmatpush3.bf16.msra.mxu0 %v1015_v3 }
  0x7b   :  { %1017 = vmatprep.subr.bf16.mxu0 %v1110_v50 }
  0x7e   :  { %1019 = vmatpush3.bf16.msra.mxu0 %v1018_v6 }
  0x7f   :  { %1020 = vmatprep.subr.bf16.mxu0 %v1110_v50 }
  0x82   :  { %1022 = vmatpush3.bf16.msra.mxu0 %v1021_v9 }
  0x83   :  { %1023 = vmatprep.subr.bf16.mxu0 %v1110_v50 }
  0x86   :  { %1025 = vmatpush3.bf16.msra.mxu0 %v1024_v28 }
 0x11c   :  { %v692_v10 = vpop.f32.mrb[0].mxu0 }
 0x11d   :  { %v693_v12 = vpop.f32.mrb[1].mxu0 }
 0x11e   :  { %v727_v13 = vpop.f32.mrb[0].mxu1  ;;  %v694_v14 = vadd.f32 %v693_v12, %v692_v10 }
 0x11f   :  { %v728_v15 = vpop.f32.mrb[1].mxu1 }
 0x120   :  { %v729_v16 = vadd.f32 %v728_v15, %v727_v13  ;;  %v238_v17 = vadd.f32 %v694_v14, %v656_v11 }
 0x122   :  { %v308_v18 = vadd.f32 %v729_v16, %v238_v17  ;;  %v447_v19 = vpop.f32.mrb[2].mxu1 }
 0x123   :  { %v808_v20 = vpop.f32.mrb[3].mxu1 }
 0x13c   :  { %v762_v21 = vpop.f32.mrb[2].mxu0 }
 0x13d   :  { %v763_v22 = vpop.f32.mrb[3].mxu0 }
 0x13e   :  { %v764_v23 = vadd.f32 %v763_v22, %v762_v21 }
 0x140   :  { %v378_v24 = vadd.f32 %v764_v23, %v308_v18 }
 0x142   :  { %v448_v25 = vadd.f32 %v447_v19, %v378_v24 }
 0x144   :  { %v451_v50 = vmax.f32 %v448_v25, 0.0 }
 0x146   :  { %842 = vmatmul.mubr.f32.vlgmr.msra.gmra.mrb[4].mxu1 %v451_v50 }
 0x219   :  { %v541_v30 = vpop.f32.mrb[4].mxu1 }
 0x21a   :  { %v542_v31 = vadd.f32 %v658_v29, %v541_v30  ;;  %v843_v32 = vpop.f32.mrb[5].mxu1 }
 0x21c   :  { %v545_v33 = vmax.f32 %v542_v31, 0.0 }
 0x21e   :  { %877 = vmatmul.mubr.f32.vlgmr.msra.gmra.mrb[4].mxu0 %v545_v33 }
 0x2f1   :  { %v635_v35 = vpop.f32.mrb[4].mxu0 }
 0x2f2   :  { %v636_v36 = vadd.f32 %v659_v34, %v635_v35  ;;  %v878_v37 = vpop.f32.mrb[5].mxu0 }
 0x2f4   :  { %639 = vst [vmem:[#allocation7] sm:$0xff] %v636_v36 }
 0x2f5   :  { %1089 = shalt.err (!%p1086_p6)
}
 0x2f6   :  { %s1090_s19 = scalar_lea.hbm %s1541_s7, 128 }
 0x2f7   :  { %p1091_p7 = scmp.ne.s32.totalorder %s1541_s7, %s1090_s19  ;;  %p1094_p8 = scmp.lt.u32.totalorder %s1090_s19, %s1541_s7 }
 0x2f9   :  { %p1096_p9 = pnand %p1094_p8, %p1091_p7 }
 0x2fb   :  { %1099 = shalt.err (!%p1096_p9)
}
 0x2fc   :  { %649 = dma.vmem_to_hbm [thread:$0]  %s647_s16, 128, %s1541_s7, [#allocation4]  }
 0x2fd   :  { %1104 = dma.done.wait [#allocation4], 128  }
 0x2fe   :  { %1105 = vsyncadd [#allocation4], 4294967168 }
 0x2ff   :  { %653 = vsyncpa [#allocation3], 1 }
 0x300   :  { %654 = vsyncpa [#allocation6], 1 }
 0x301   :  { %655 = vsyncpa [#allocation4], 1 }

</bundles_post_ra>
